<compile_context>
chip_gen: v7x
topology: tpu7x:2x2x1
jax: 0.10.0
libtpu: 0.0.40
codegen_flags: <defaults>
</compile_context>

<pallas_src>
import jax
import jax.numpy as jnp
from jax.experimental import pallas as pl
from jax.experimental.pallas import tpu as pltpu

EPS = 1e-5


# ----------------------------------------------------------------------------
# Kernel: one Dout tile per grid step, full batch resident.
# ----------------------------------------------------------------------------
def head_kernel(x_ref, w_ref, g_ref, beta_ref, o_ref):
    # x_ref:    [B, Din]   f32   VMEM (resident across the whole grid)
    # w_ref:    [Din, tn]  bf16  VMEM (one Dout tile of the pre-transposed W)
    # g_ref:    [1, tn]    f32   VMEM (BatchNorm gamma, zero-padded tail)
    # beta_ref: [1, tn]    f32   VMEM (BatchNorm beta,  zero-padded tail)
    # o_ref:    [B, tn]    f32   VMEM
    #
    # Cast the LHS to bf16 inside the kernel (VMEM-local, no extra HBM pass);
    # MXU accumulates in f32.  The Linear bias is omitted: under training-mode
    # BatchNorm1d the batch-mean subtraction removes it exactly.
    x_bf = x_ref[...].astype(jnp.bfloat16)
    z = jnp.dot(x_bf, w_ref[...], preferred_element_type=jnp.float32)

    # BatchNorm1d (training mode): batch mean + biased batch variance, f32.
    mean = jnp.mean(z, axis=0, keepdims=True)
    centered = z - mean
    var = jnp.mean(centered * centered, axis=0, keepdims=True)

    # Fold gamma * inv_std into one tiny [1, tn] per-column scale, then a
    # single full-size FMA.  Padded columns: W pad is 0 -> z = 0 -> centered
    # = 0, and gamma pad is 0 -> scale = 0, so the padded output is exactly 0
    # (and is sliced off outside anyway).
    scale = g_ref[...] * jax.lax.rsqrt(var + EPS)
    o_ref[...] = centered * scale + beta_ref[...]


# ----------------------------------------------------------------------------
# One-time parameter preparation (hoisted out of the per-call forward path).
# ----------------------------------------------------------------------------
def prepare_head_params(w_t, b, gamma, beta):
    """Pad/cast Linear+BN parameters once.

    w_t:   [Din, Dout] f32 (nn.Linear weight, pre-transposed)
    b:     [1, Dout]   f32 (accepted for nn.Linear parity; unused — it cancels
                            exactly under training-mode BatchNorm)
    gamma: [1, Dout]   f32
    beta:  [1, Dout]   f32
    """
    del b  # exact algebraic cancellation under batch-mean subtraction
    din, dout = w_t.shape
    dp = ((dout + 127) // 128) * 128        # lane-dense output columns
    pad = dp - dout
    if pad:
        w_t = jnp.pad(w_t, ((0, 0), (0, pad)))
        gamma = jnp.pad(gamma, ((0, 0), (0, pad)))
        beta = jnp.pad(beta, ((0, 0), (0, pad)))
    # Prefer 256-wide tiles (v6e/v7x MXU is 2x256^2); fall back to 128 (v5e).
    tn = 256 if dp % 256 == 0 else 128
    return {
        "w_bf": w_t.astype(jnp.bfloat16),   # bf16 weight, cast once
        "gamma": gamma,
        "beta": beta,
        "din": din,
        "dout": dout,
        "dp": dp,
        "tn": tn,
    }


# ----------------------------------------------------------------------------
# Forward wrapper: only the pallas_call (and the output un-pad slice).
# ----------------------------------------------------------------------------
def dense_head(x, params):
    """x: [B, Din] f32 features from the (elided) DenseNet backbone."""
    B, Din = x.shape
    assert Din == params["din"]
    Dp, tn = params["dp"], params["tn"]
    nd = Dp // tn

    cost = pl.CostEstimate(
        flops=2 * B * Din * Dp + 8 * B * Dp,
        transcendentals=Dp,
        bytes_accessed=(x.size * 4 + params["w_bf"].size * 2
                        + (params["gamma"].size + params["beta"].size) * 4
                        + B * Dp * 4),
    )

    out = pl.pallas_call(
        head_kernel,
        out_shape=jax.ShapeDtypeStruct((B, Dp), jnp.float32),
        grid=(nd,),
        in_specs=[
            # x: constant block index -> DMA'd once, resident across Dout tiles.
            pl.BlockSpec((B, Din), lambda d: (0, 0)),
            # W / gamma / beta: one Dout tile per grid step (pipelined).
            pl.BlockSpec((Din, tn), lambda d: (0, d)),
            pl.BlockSpec((1, tn), lambda d: (0, d)),
            pl.BlockSpec((1, tn), lambda d: (0, d)),
        ],
        out_specs=pl.BlockSpec((B, tn), lambda d: (0, d)),
        compiler_params=pltpu.CompilerParams(
            # Dout tiles are independent (per-column BN stats) -> megacore.
            dimension_semantics=("parallel",),
            # v5e default scoped VMEM is 16 MiB; 48 MiB fits v7x's 64 MiB too.
            vmem_limit_bytes=48 * 1024 * 1024,
        ),
        cost_estimate=cost,
    )(x, params["w_bf"], params["gamma"], params["beta"])

    dout = params["dout"]
    return out[:, :dout] if dout != Dp else out


# ----------------------------------------------------------------------------
# Pure-JAX references.
# ----------------------------------------------------------------------------
def reference_head_f32(x, w_t, b, gamma, beta):
    """Full-f32 reference mirroring Linear + BatchNorm1d(train)."""
    z = x @ w_t + b
    mean = jnp.mean(z, axis=0, keepdims=True)
    var = jnp.mean((z - mean) ** 2, axis=0, keepdims=True)
    return gamma * (z - mean) / jnp.sqrt(var + EPS) + beta


def reference_head_bf16_matmul(x, w_t, b, gamma, beta):
    """Same math with bf16-quantized matmul operands (matches kernel inputs)."""
    xq = x.astype(jnp.bfloat16).astype(jnp.float32)
    wq = w_t.astype(jnp.bfloat16).astype(jnp.float32)
    z = xq @ wq + b
    mean = jnp.mean(z, axis=0, keepdims=True)
    var = jnp.mean((z - mean) ** 2, axis=0, keepdims=True)
    return gamma * (z - mean) / jnp.sqrt(var + EPS) + beta


if __name__ == "__main__":
    key = jax.random.PRNGKey(0)
    B = 16                # batch (multiple of 16 -> full bf16 sublane pack)
    pretrain_dim = 1024   # DenseNet-121 feature width
    label_dim = 300       # pads to 384 -> a 3-step Dout grid at tn = 128

    k_x, k_w, k_b, k_g, k_be = jax.random.split(key, 5)

    bound = 1.0 / jnp.sqrt(jnp.float32(pretrain_dim))
    x = jax.random.normal(k_x, (B, pretrain_dim), dtype=jnp.float32)
    w_t = jax.random.uniform(k_w, (pretrain_dim, label_dim),
                             minval=-bound, maxval=bound, dtype=jnp.float32)
    b = jax.random.uniform(k_b, (1, label_dim),
                           minval=-bound, maxval=bound, dtype=jnp.float32)
    gamma = jnp.ones((1, label_dim), jnp.float32) + 0.01 * jax.random.normal(
        k_g, (1, label_dim), dtype=jnp.float32)
    beta = 0.01 * jax.random.normal(k_be, (1, label_dim), dtype=jnp.float32)

    # One-time parameter prep (hoisted out of the forward path).
    params = prepare_head_params(w_t, b, gamma, beta)
    params = jax.tree_util.tree_map(
        lambda v: jax.block_until_ready(v) if isinstance(v, jax.Array) else v,
        params)

    out = dense_head(x, params)
    out = jax.block_until_ready(out)
    assert out.shape == (B, label_dim)

    # Tight check vs. a reference using the same bf16-quantized matmul operands.
    ref_matched = reference_head_bf16_matmul(x, w_t, b, gamma, beta)
    assert jnp.allclose(out, ref_matched, atol=2e-3, rtol=2e-3), \
        "mismatch vs matched-precision reference"

    # Loose check vs. the full-f32 reference (bf16 matmul-input quantization).
    ref_f32 = reference_head_f32(x, w_t, b, gamma, beta)
    assert jnp.allclose(out, ref_f32, atol=5e-2, rtol=5e-2), \
        "mismatch vs f32 reference"

    print("KERNEL_OK")
</pallas_src>

<mosaic_0001>
module attributes {stable_mosaic.version = 11 : i64} {
  func.func @head_kernel(%arg0: i32, %arg1: memref<16x1024xf32, #tpu.memory_space<vmem>>, %arg2: memref<1024x128xbf16, #tpu.memory_space<vmem>>, %arg3: memref<1x128xf32, #tpu.memory_space<vmem>>, %arg4: memref<1x128xf32, #tpu.memory_space<vmem>>, %arg5: memref<16x128xf32, #tpu.memory_space<vmem>>) attributes {dimension_semantics = [#tpu.dimension_semantics<parallel>], iteration_bounds = array<i64: 3>, scalar_prefetch = 0 : i64, scratch_operands = 0 : i64, tpu.core_type = #tpu.core_type<tc>, window_params = [{pipeline_mode = #tpu.pipeline_mode<synchronous>, transform_indices = @transform_0, window_bounds = array<i64: 16, 1024>}, {transform_indices = @transform_1, window_bounds = array<i64: 1024, 128>}, {transform_indices = @transform_2, window_bounds = array<i64: 1, 128>}, {transform_indices = @transform_3, window_bounds = array<i64: 1, 128>}, {transform_indices = @transform_4, window_bounds = array<i64: 16, 128>}]} {
    %c0 = arith.constant 0 : index
    %c0_0 = arith.constant 0 : index
    %0 = vector.load %arg1[%c0, %c0_0] : memref<16x1024xf32, #tpu.memory_space<vmem>>, vector<16x1024xf32>
    %1 = arith.truncf %0 : vector<16x1024xf32> to vector<16x1024xbf16>
    %c0_1 = arith.constant 0 : index
    %c0_2 = arith.constant 0 : index
    %2 = vector.load %arg2[%c0_1, %c0_2] : memref<1024x128xbf16, #tpu.memory_space<vmem>>, vector<1024x128xbf16>
    %cst = arith.constant dense<0.000000e+00> : vector<16x128xf32>
    %3 = tpu.matmul %1, %2, %cst {dimension_numbers = #tpu.dot_dimension_numbers<[1], [0], [0], [1], [0, 0, 1, 1], [], []>} : vector<16x1024xbf16>, vector<1024x128xbf16>, vector<16x128xf32> -> vector<16x128xf32>
    %cst_3 = arith.constant dense<0.000000e+00> : vector<128xf32>
    %4 = vector.multi_reduction <add>, %3, %cst_3 [0] : vector<16x128xf32> to vector<128xf32>
    %5 = vector.shape_cast %4 : vector<128xf32> to vector<1x128xf32>
    %cst_4 = arith.constant 1.600000e+01 : f32
    %6 = vector.broadcast %cst_4 : f32 to vector<1x128xf32>
    %7 = arith.divf %5, %6 : vector<1x128xf32>
    %8 = vector.broadcast %7 : vector<1x128xf32> to vector<16x128xf32>
    %9 = arith.subf %3, %8 : vector<16x128xf32>
    %10 = arith.mulf %9, %9 : vector<16x128xf32>
    %cst_5 = arith.constant dense<0.000000e+00> : vector<128xf32>
    %11 = vector.multi_reduction <add>, %10, %cst_5 [0] : vector<16x128xf32> to vector<128xf32>
    %12 = vector.shape_cast %11 : vector<128xf32> to vector<1x128xf32>
    %cst_6 = arith.constant 1.600000e+01 : f32
    %13 = vector.broadcast %cst_6 : f32 to vector<1x128xf32>
    %14 = arith.divf %12, %13 : vector<1x128xf32>
    %c0_7 = arith.constant 0 : index
    %c0_8 = arith.constant 0 : index
    %15 = vector.load %arg3[%c0_7, %c0_8] : memref<1x128xf32, #tpu.memory_space<vmem>>, vector<1x128xf32>
    %cst_9 = arith.constant 9.99999974E-6 : f32
    %16 = vector.broadcast %cst_9 : f32 to vector<1x128xf32>
    %17 = arith.addf %14, %16 : vector<1x128xf32>
    %18 = math.rsqrt %17 : vector<1x128xf32>
    %19 = arith.mulf %15, %18 : vector<1x128xf32>
    %20 = vector.broadcast %19 : vector<1x128xf32> to vector<16x128xf32>
    %21 = arith.mulf %9, %20 : vector<16x128xf32>
    %c0_10 = arith.constant 0 : index
    %c0_11 = arith.constant 0 : index
    %22 = vector.load %arg4[%c0_10, %c0_11] : memref<1x128xf32, #tpu.memory_space<vmem>>, vector<1x128xf32>
    %23 = vector.broadcast %22 : vector<1x128xf32> to vector<16x128xf32>
    %24 = arith.addf %21, %23 : vector<16x128xf32>
    %c0_12 = arith.constant 0 : index
    %c0_13 = arith.constant 0 : index
    %25 = vector.load %arg5[%c0_12, %c0_13] : memref<16x128xf32, #tpu.memory_space<vmem>>, vector<16x128xf32>
    tpu.vector_store %arg5[%c0_12, %c0_13], %24 {strides = array<i32>} : memref<16x128xf32, #tpu.memory_space<vmem>>, vector<16x128xf32>,
    return
  }
  func.func @transform_0(%arg0: i32) -> (i32, i32) {
    %c0_i32 = arith.constant 0 : i32
    %c0_i32_0 = arith.constant 0 : i32
    %c0_i32_1 = arith.constant 0 : i32
    return %c0_i32, %c0_i32_0 : i32, i32
  }
  func.func @transform_1(%arg0: i32) -> (i32, i32) {
    %c0_i32 = arith.constant 0 : i32
    %c0_i32_0 = arith.constant 0 : i32
    return %c0_i32, %arg0 : i32, i32
  }
  func.func @transform_2(%arg0: i32) -> (i32, i32) {
    %c0_i32 = arith.constant 0 : i32
    %c0_i32_0 = arith.constant 0 : i32
    return %c0_i32, %arg0 : i32, i32
  }
  func.func @transform_3(%arg0: i32) -> (i32, i32) {
    %c0_i32 = arith.constant 0 : i32
    %c0_i32_0 = arith.constant 0 : i32
    return %c0_i32, %arg0 : i32, i32
  }
  func.func @transform_4(%arg0: i32) -> (i32, i32) {
    %c0_i32 = arith.constant 0 : i32
    %c0_i32_0 = arith.constant 0 : i32
    return %c0_i32, %arg0 : i32, i32
  }
}

</mosaic_0001>

<bundles_post_ra>
// kernel: tpu_custom_call.1
= control target key start
LH: loop header
LB: loop body
LE: loop exit
PB: predicated region body
PF: predicated region fallthrough
CT: control target
= control target key end

     0   :  { %9 = vsyncpa [#allocation3], 0  ;;  %s1856_s0 = inlined_call_operand.hbm [shape: f32[16,1024], index: 0, kind: input, shape index: {}]   ;;  %s1857_s1 = inlined_call_operand.hbm [shape: bf16[1024,384], index: 1, kind: input, shape index: {}]   ;;  %s1858_s2 = inlined_call_operand.vmem [shape: f32[1,384], index: 2, kind: input, shape index: {}]   ;;  %s1859_s3 = inlined_call_operand.vmem [shape: f32[1,384], index: 3, kind: input, shape index: {}]   ;;  %s1860_s4 = inlined_call_operand.hbm [shape: f32[16,384], index: 4, kind: output, shape index: {}]  }
   0x1   :  { %10 = vsyncpa [#allocation6], 0 }
   0x2   :  { %12 = vsyncpa [#allocation6 + $0x1], 0 }
   0x3   :  { %13 = vsyncpa [#allocation4], 0 }
   0x4   :  { %15 = vsyncpa [#allocation4 + $0x1], 0  ;;  %s1581_s15 = smov 0   ;;  %s1583_s16 = smov 0  }
   0x5   :  { %s1585_s17 = smov 0   ;;  %s1587_s18 = smov 0  }
   0x6 LB: > { %s1602_s19 = sadd.s32 4294967295, %s1544_s18   ;;  %s1119_s20 = sadd.s32 4294967294, %s1544_s18   ;;  %s1544_s18 = sphi %s1587_s18, %s1883_s18   ;;  %s1540_s17 = sphi %s1585_s17, %s1882_s17   ;;  %s1536_s16 = sphi %s1583_s16, %s1881_s16   ;;  %s1532_s15 = sphi %s1581_s15, %s1880_s15  }
   0x7   : > { %s1606_s21 = sadd.s32 1, %s1544_s18   ;;  %s49_s22 = sadd.s32 1, %s1540_s17 }
   0x8   : > { %s46_s23 = ssub.s32 %s1544_s18, %s1606_s21  ;;  %p56_p0 = scmp.ne.s32.totalorder %s1540_s17, %s1536_s16 }
   0x9   : > { %p47_p1 = scmp.eq.s32.totalorder %s46_s23, 0  ;;  %p57_p2 = scmp.eq.s32.totalorder %s1544_s18, 0 }
   0xa   : > { %p62_p3 = scmp.ne.s32.totalorder %s1536_s16, %s1532_s15  ;;  %p1861_p4 = scmp.eq.s32.totalorder %s1602_s19, 0 }
   0xb   : > { %s1618_s24 = scalar_select %p47_p1, %s1540_s17, %s49_s22  }
   0xc   : > { %p1620_p5 = por %p57_p2, %p56_p0  ;;  %p1626_p6 = por %p1861_p4, %p62_p3 }
   0xd   : > { %p138_p7 = scmp.eq.s32.totalorder %s1602_s19, 2  ;;  %p144_p8 = scmp.eq.s32.totalorder %s1119_s20, 2 }
   0xe   : > { %s1865_s25 = scalar_select %p1620_p5, 1, 0 }
   0xf   : > { %s1866_s26 = scalar_select %p1626_p6, 1, 0 }
  0x10   : > { %p1120_p9 = scmp.ge.s32.totalorder %s1544_s18, 1  ;;  %p151_p10 = scmp.lt.s32.totalorder %s1544_s18, 4 }
  0x11   : > { %p1633_p11 = por %p138_p7, %p56_p0  ;;  %p1637_p12 = por %p144_p8, %p62_p3 }
  0x12   : > { %p1641_p13 = pnand %p1120_p9, %p151_p10  ;;  %s1546_s30 = smov [#allocation2]  }
  0x13   : > { %s1867_s27 = scalar_select %p1633_p11, 1, 0 }
  0x14   : > { %s1868_s28 = scalar_select %p1637_p12, 1, 0 }
  0x15   : > { %s1869_s29 = scalar_select %p1641_p13, 1, 0 }
  0x16   : > { %p1294_p1 = pneg %p1641_p13  ;;  %s163_s5 = sshll.u32 %s1546_s30, 4  ;;  %s164_s5 = int_to_ptr.vmem [resolvable:$true] %s163_s5 }
  0x17   : > { %s177_s7 = sand.u32 1, %s1540_s17   ;;  %s1416_s10 = scalar_lea.hbm %s1856_s0, 2048 }
  0x18   : > { %p1649_p2 = pnand %p1294_p1, %p1861_p4  ;;  %p1417_p3 = scmp.ne.s32.totalorder %s1856_s0, %s1416_s10 }
  0x19   : > { %p1423_p10 = scmp.lt.u32.totalorder %s1416_s10, %s1856_s0 }
  0x1a   : > { %p1418_p7 = pneg %p1649_p2 }
  0x1c   : > { %p1419_p8 = pnand %p1418_p7, %p1417_p3 }
  0x1e   : > { %p1420_p9 = pneg %p1419_p8 }
  0x20   : > { %p1425_p1 = pnand %p1423_p10, %p1420_p9 }
  0x22   : > { %1428 = shalt.err (!%p1425_p1)
}
  0x23   : > { %s1429_s20 = scalar_lea.vmem %s164_s5, 2048  ;;  %p1437_p11 = scmp.lt.s32.totalorder %s164_s5, %s164_s5 }
  0x24   : > { %p1430_p4 = scmp.ne.s32.totalorder %s164_s5, %s1429_s20  ;;  %p1438_p6 = scmp.lt.s32.totalorder %s1429_s20, %s1429_s20 }
  0x26   : > { %p1432_p0 = pnand %p1430_p4, %p1418_p7  ;;  %p1439_p13 = por %p1438_p6, %p1437_p11 }
  0x28   : > { %p1433_p12 = pneg %p1432_p0 }
  0x2a   : > { %p1440_p5 = pnand %p1439_p13, %p1433_p12 }
  0x2c   : > { %1443 = shalt.err (!%p1440_p5)
}
  0x2d   : > { %s1547_s22 = smov 1024   ;;  %s1548_s23 = smov 64  }
  0x2e   : > { %1297 = dma.hbm_to_vmem [thread:$0]  (!%p1649_p2), %s1856_s0, 2048, %s164_s5, [#allocation3], %s1547_s22, %s1547_s22, %s1548_s23  }
  0x2f   : > { %p1871_p3 = scmp.ne.s32.totalorder %s1865_s25, 0  ;;  %p1872_p4 = scmp.lt.s32.totalorder %s1544_s18, 3 }
  0x30   : > { %s1123_s10 = sshll.u32 %s177_s7, 9  ;;  %s1124_s11 = sshll.u32 %s1544_s18, 6 }
  0x31   : > { %p1676_p0 = pnand %p1872_p4, %p1871_p3  ;;  %s1684_s14 = scalar_lea.hbm %s1857_s1, %s1124_s11 }
  0x32   : > { %s181_s5 = scalar_lea.vmem [#allocation5], %s1123_s10  ;;  %s1688_s6 = scalar_lea.sflag [#allocation6], %s177_s7 }
  0x33   : > { %s187_s25 = sshll.u32 %s181_s5, 4  ;;  %s1444_s20 = scalar_lea.hbm %s1684_s14, 8192  ;;  %s1686_s25 = int_to_ptr.vmem [resolvable:$true] %s187_s25 }
  0x34   : > { %p1445_p5 = scmp.ne.s32.totalorder %s1684_s14, %s1444_s20  ;;  %p1446_p6 = pneg %p1676_p0 }
  0x35   : > { %s1449_s8 = scalar_lea.hbm %s1857_s1, 24576  ;;  %p1450_p13 = scmp.lt.u32.totalorder %s1684_s14, %s1857_s1 }
  0x36   : > { %p1447_p11 = pnand %p1446_p6, %p1445_p5  ;;  %p1451_p2 = scmp.lt.u32.totalorder %s1449_s8, %s1444_s20 }
  0x37   : > { %p1453_p8 = scmp.lt.u32.totalorder %s1444_s20, %s1684_s14 }
  0x38   : > { %p1448_p12 = pneg %p1447_p11  ;;  %p1452_p7 = por %p1451_p2, %p1450_p13 }
  0x3a   : > { %p1454_p9 = por %p1453_p8, %p1452_p7 }
  0x3c   : > { %p1455_p10 = pnand %p1454_p9, %p1448_p12 }
  0x3e   : > { %1458 = shalt.err (!%p1455_p10)
}
  0x3f   : > { %s1459_s7 = scalar_lea.vmem %s1686_s25, 8192  ;;  %s1549_s10 = smov [#allocation5]  }
  0x40   : > { %p1460_p1 = scmp.ne.s32.totalorder %s1686_s25, %s1459_s7  ;;  %s1464_s13 = sshll.u32 %s1549_s10, 4  ;;  %s1465_s13 = int_to_ptr.vmem [resolvable:$false] %s1464_s13 }
  0x41   : > { %s1466_s5 = scalar_lea.vmem %s1465_s13, 16384  ;;  %p1467_p5 = scmp.lt.s32.totalorder %s1686_s25, %s1465_s13 }
  0x42   : > { %p1462_p3 = pnand %p1460_p1, %p1446_p6  ;;  %p1468_p11 = scmp.lt.s32.totalorder %s1466_s5, %s1459_s7 }
  0x44   : > { %p1463_p4 = pneg %p1462_p3  ;;  %p1469_p13 = por %p1468_p11, %p1467_p5 }
  0x46   : > { %p1470_p2 = pnand %p1469_p13, %p1463_p4 }
  0x48   : > { %1473 = shalt.err (!%p1470_p2)
}
  0x49   : > { %s1550_s20 = smov 192   ;;  %s1551_s22 = smov 4  }
  0x4a   : > { %1301 = dma.hbm_to_vmem [thread:$0]  (!%p1676_p0), %s1684_s14, 8192, %s1686_s25, %s1688_s6, %s1550_s20, %s1548_s23, %s1551_s22  }
  0x4b   : > { %p1874_p6 = scmp.ne.s32.totalorder %s1869_s29, 0 }
  0x4c   : > { %p1875_p12 = scmp.eq.s32.totalorder (!%p1874_p6), %s1602_s19, 0 }
  0x4d   : > { %211 = sbr.rel (%p1874_p6) target bundleno = 449 (0x1c1), region = 36 }
  0x54   : > { %1519 = dma.done.wait (%p1875_p12), [#allocation3], 2048   ;;  %p1876_p7 = pmov %p1875_p12 }
  0x55   : > { %s1724_s30 = sand.u32 1, %s1536_s16   ;;  %p1877_p0 = scmp.ne.s32.totalorder %s1866_s26, 0 }
  0x56   : > { %1521 = vsyncadd (%p1876_p7), [#allocation3], 4294965248  ;;  %s1127_s8 = sshll.u32 %s1724_s30, 9  ;;  %s218_s11 = scalar_lea.sflag [#allocation6], %s1724_s30 }
  0x57   : > { %s1728_s9 = scalar_lea.vmem [#allocation5], %s1127_s8 }
  0x58   : > { %1523 = dma.done.wait (%p1877_p0), %s218_s11, 8192  }
  0x59   : > { %1525 = vsyncadd (%p1877_p0), %s218_s11, 4294959104  ;;  %v1350_v0 = vld [vmem:[%s1728_s9 + $0x40] sm:$0xff]   ;;  %v1354_v4 = vld [vmem:[%s1728_s9 + $0x48] sm:$0xff]   ;;  %p252_p8 = scmp.lt.s32.totalorder %s1602_s19, 2  ;;  %s1128_s25 = sshll.u32 %s1724_s30, 4 }
  0x5a   : > { %v1351_v1 = vld [vmem:[%s1728_s9 + $0xc0] sm:$0xff]   ;;  %1198 = vmatprep.subr.bf16.mxu0 %v1350_v0  ;;  %v1355_v5 = vld [vmem:[%s1728_s9 + $0xc8] sm:$0xff]   ;;  %v1358_v8 = vld [vmem:[%s1728_s9 + $0x50] sm:$0xff]   ;;  %s251_s10 = scalar_lea.vmem [#allocation7], %s1128_s25  ;;  %s1195_s5 = sshll.u32 %s1602_s19, 7 }
  0x5b   : > { %v1352_v2 = vld [vmem:[%s1728_s9] sm:$0xff]   ;;  %1220 = vmatprep.subr.bf16.mxu1 %v1351_v1  ;;  %v1356_v6 = vld [vmem:[%s1728_s9 + $0x8] sm:$0xff]   ;;  %v1359_v9 = vld [vmem:[%s1728_s9 + $0xd0] sm:$0xff]   ;;  %s253_s26 = scalar_select %p252_p8, %s1602_s19, 2 }
  0x5c   : > { %v1353_v3 = vld [vmem:[%s1728_s9 + $0x80] sm:$0xff]   ;;  %1199 = vmatpush3.bf16.msra.mxu0 %v1352_v2  ;;  %v1357_v7 = vld [vmem:[%s1728_s9 + $0x88] sm:$0xff]   ;;  %v1360_v10 = vld [vmem:[%s1728_s9 + $0x10] sm:$0xff]   ;;  %s1016_s13 = sshll.u32 %s251_s10, 4  ;;  %s1813_s8 = scalar_lea.hbm %s1860_s4, %s1195_s5  ;;  %s1808_s13 = int_to_ptr.vmem [resolvable:$true] %s1016_s13 }
  0x5d   : > { %1221 = vmatpush3.bf16.msra.mxu1 %v1353_v3  ;;  %1200 = vmatprep.subr.bf16.mxu0 %v1354_v4  ;;  %v1361_v11 = vld [vmem:[%s1728_s9 + $0x90] sm:$0xff]   ;;  %v1362_v12 = vld [vmem:[%s1728_s9 + $0x58] sm:$0xff]   ;;  %v1366_v16 = vld [vmem:[%s1728_s9 + $0x60] sm:$0xff]   ;;  %s254_s14 = scalar_lea.vmem %s1858_s2, %s253_s26  ;;  %s257_s7 = scalar_lea.vmem %s1859_s3, %s253_s26 }
  0x5e   : > { %1222 = vmatprep.subr.bf16.mxu1 %v1355_v5  ;;  %v1363_v13 = vld [vmem:[%s1728_s9 + $0xd8] sm:$0xff]   ;;  %v1367_v17 = vld [vmem:[%s1728_s9 + $0xe0] sm:$0xff]   ;;  %v1370_v20 = vld [vmem:[%s1728_s9 + $0x68] sm:$0xff]   ;;  %s1004_s11 = scalar_lea.sflag [#allocation4], %s1724_s30  ;;  %p1878_p10 = scmp.ne.s32.totalorder %s1867_s27, 0 }
  0x5f   : > { %v1364_v14 = vld [vmem:[%s1728_s9 + $0x18] sm:$0xff]   ;;  %v1368_v18 = vld [vmem:[%s1728_s9 + $0x20] sm:$0xff]   ;;  %v1371_v21 = vld [vmem:[%s1728_s9 + $0xe8] sm:$0xff]   ;;  %s1552_s19 = smov [#allocation7]  }
  0x60   : > { %1201 = vmatpush3.bf16.msra.mxu0 %v1356_v6  ;;  %v1365_v15 = vld [vmem:[%s1728_s9 + $0x98] sm:$0xff]   ;;  %v1369_v19 = vld [vmem:[%s1728_s9 + $0xa0] sm:$0xff]   ;;  %v1372_v22 = vld [vmem:[%s1728_s9 + $0x28] sm:$0xff]   ;;  %s1478_s26 = sshll.u32 %s1552_s19, 4  ;;  %s1479_s26 = int_to_ptr.vmem [resolvable:$false] %s1478_s26 }
  0x61   : > { %1223 = vmatpush3.bf16.msra.mxu1 %v1357_v7  ;;  %1202 = vmatprep.subr.bf16.mxu0 %v1358_v8  ;;  %v1373_v23 = vld [vmem:[%s1728_s9 + $0xa8] sm:$0xff]   ;;  %v1374_v24 = vld [vmem:[%s1728_s9 + $0x70] sm:$0xff]   ;;  %v1378_v28 = vld [vmem:[%s1728_s9 + $0x78] sm:$0xff]   ;;  %s1480_s29 = scalar_lea.vmem %s1479_s26, 512  ;;  %p1481_p4 = scmp.lt.s32.totalorder %s1808_s13, %s1479_s26 }
  0x62   : > { %1224 = vmatprep.subr.bf16.mxu1 %v1359_v9  ;;  %v1375_v25 = vld [vmem:[%s1728_s9 + $0xf0] sm:$0xff]   ;;  %v1379_v29 = vld [vmem:[%s1728_s9 + $0xf8] sm:$0xff]   ;;  %v260_v32 = vld [vmem:[#allocation2 + $0x8] sm:$0xff] }
  0x63   : > { %v1376_v26 = vld [vmem:[%s1728_s9 + $0x30] sm:$0xff]   ;;  %v1380_v30 = vld [vmem:[%s1728_s9 + $0x38] sm:$0xff]   ;;  %v268_v33 = vld [vmem:[#allocation2 + $0x48] sm:$0xff] }
  0x64   : > { %1203 = vmatpush3.bf16.msra.mxu0 %v1360_v10  ;;  %v1377_v27 = vld [vmem:[%s1728_s9 + $0xb0] sm:$0xff]   ;;  %v1381_v31 = vld [vmem:[%s1728_s9 + $0xb8] sm:$0xff]   ;;  %v276_v35 = vpack.c.bf16 %v268_v33, %v260_v32  ;;  %v259_v37 = vld [vmem:[#allocation2] sm:$0xff] }
  0x65   : > { %1225 = vmatpush3.bf16.msra.mxu1 %v1361_v11  ;;  %1204 = vmatprep.subr.bf16.mxu0 %v1362_v12  ;;  %v262_v34 = vld [vmem:[#allocation2 + $0x18] sm:$0xff]  ;;  %v267_v38 = vld [vmem:[#allocation2 + $0x40] sm:$0xff]  ;;  %v261_v41 = vld [vmem:[#allocation2 + $0x10] sm:$0xff] }
  0x66   : > { %1226 = vmatprep.subr.bf16.mxu1 %v1363_v13  ;;  %v270_v36 = vld [vmem:[#allocation2 + $0x58] sm:$0xff]  ;;  %v275_v40 = vpack.c.bf16 %v267_v38, %v259_v37  ;;  %v269_v42 = vld [vmem:[#allocation2 + $0x50] sm:$0xff]  ;;  %827 = vmatprep.mubr.bf16.mxu0 %v276_v35  ;;  %v1382_v44 = vld [vmem:[%s1728_s9 + $0x140] sm:$0xff]  }
  0x67   : > { %v278_v39 = vpack.c.bf16 %v270_v36, %v262_v34  ;;  %v277_v43 = vpack.c.bf16 %v269_v42, %v261_v41  ;;  %v1383_v45 = vld [vmem:[%s1728_s9 + $0x1c0] sm:$0xff]   ;;  %v1386_v48 = vld [vmem:[%s1728_s9 + $0x148] sm:$0xff]   ;;  %v1390_v52 = vld [vmem:[%s1728_s9 + $0x150] sm:$0xff]  }
  0x68   : > { %1205 = vmatpush3.bf16.msra.mxu0 %v1364_v14  ;;  %v1384_v46 = vld [vmem:[%s1728_s9 + $0x100] sm:$0xff]   ;;  %v1387_v49 = vld [vmem:[%s1728_s9 + $0x1c8] sm:$0xff]   ;;  %v1391_v53 = vld [vmem:[%s1728_s9 + $0x1d0] sm:$0xff]  }
  0x69   : > { %1227 = vmatpush3.bf16.msra.mxu1 %v1365_v15  ;;  %1206 = vmatprep.subr.bf16.mxu0 %v1366_v16  ;;  %v1385_v47 = vld [vmem:[%s1728_s9 + $0x180] sm:$0xff]   ;;  %v1388_v50 = vld [vmem:[%s1728_s9 + $0x108] sm:$0xff]   ;;  %v1392_v54 = vld [vmem:[%s1728_s9 + $0x110] sm:$0xff]  }
  0x6a   : > { %1228 = vmatprep.subr.bf16.mxu1 %v1367_v17  ;;  %868 = vmatprep.mubr.bf16.mxu1 %v278_v39  ;;  %v1389_v51 = vld [vmem:[%s1728_s9 + $0x188] sm:$0xff]   ;;  %v1393_v55 = vld [vmem:[%s1728_s9 + $0x190] sm:$0xff]   ;;  %v1394_v56 = vld [vmem:[%s1728_s9 + $0x158] sm:$0xff]  }
  0x6b   : > { %v1395_v57 = vld [vmem:[%s1728_s9 + $0x1d8] sm:$0xff]   ;;  %v1398_v60 = vld [vmem:[%s1728_s9 + $0x160] sm:$0xff]   ;;  %v1402_v0 = vld [vmem:[%s1728_s9 + $0x168] sm:$0xff]  }
  0x6c   : > { %1207 = vmatpush3.bf16.msra.mxu0 %v1368_v18  ;;  %v1396_v58 = vld [vmem:[%s1728_s9 + $0x118] sm:$0xff]   ;;  %v1399_v61 = vld [vmem:[%s1728_s9 + $0x1e0] sm:$0xff]   ;;  %v1403_v1 = vld [vmem:[%s1728_s9 + $0x1e8] sm:$0xff]  }
  0x6d   : > { %1229 = vmatpush3.bf16.msra.mxu1 %v1369_v19  ;;  %1208 = vmatprep.subr.bf16.mxu0 %v1370_v20  ;;  %v1397_v59 = vld [vmem:[%s1728_s9 + $0x198] sm:$0xff]   ;;  %v1400_v62 = vld [vmem:[%s1728_s9 + $0x120] sm:$0xff]   ;;  %v1404_v2 = vld [vmem:[%s1728_s9 + $0x128] sm:$0xff]  }
  0x6e   : > { %1230 = vmatprep.subr.bf16.mxu1 %v1371_v21  ;;  %v1401_v63 = vld [vmem:[%s1728_s9 + $0x1a0] sm:$0xff]   ;;  %v1405_v3 = vld [vmem:[%s1728_s9 + $0x1a8] sm:$0xff]   ;;  %v1406_v4 = vld [vmem:[%s1728_s9 + $0x170] sm:$0xff]  }
  0x6f   : > { %v1407_v5 = vld [vmem:[%s1728_s9 + $0x1f0] sm:$0xff]   ;;  %v1410_v8 = vld [vmem:[%s1728_s9 + $0x178] sm:$0xff]   ;;  %v264_v12 = vld [vmem:[#allocation2 + $0x28] sm:$0xff] }
  0x70   : > { %1209 = vmatpush3.bf16.msra.mxu0 %v1372_v22  ;;  %v1408_v6 = vld [vmem:[%s1728_s9 + $0x130] sm:$0xff]   ;;  %v1411_v9 = vld [vmem:[%s1728_s9 + $0x1f8] sm:$0xff]   ;;  %v272_v13 = vld [vmem:[#allocation2 + $0x68] sm:$0xff] }
  0x71   : > { %1231 = vmatpush3.bf16.msra.mxu1 %v1373_v23  ;;  %1210 = vmatprep.subr.bf16.mxu0 %v1374_v24  ;;  %v1409_v7 = vld [vmem:[%s1728_s9 + $0x1b0] sm:$0xff]   ;;  %v1412_v10 = vld [vmem:[%s1728_s9 + $0x138] sm:$0xff]   ;;  %v280_v16 = vpack.c.bf16 %v272_v13, %v264_v12  ;;  %v263_v18 = vld [vmem:[#allocation2 + $0x20] sm:$0xff] }
  0x72   : > { %1232 = vmatprep.subr.bf16.mxu1 %v1375_v25  ;;  %v1413_v11 = vld [vmem:[%s1728_s9 + $0x1b8] sm:$0xff]   ;;  %v271_v19 = vld [vmem:[#allocation2 + $0x60] sm:$0xff]  ;;  %v265_v20 = vld [vmem:[#allocation2 + $0x30] sm:$0xff]  ;;  %s1474_s9 = scalar_lea.vmem %s1808_s13, 256 }
  0x73   : > { %v266_v14 = vld [vmem:[#allocation2 + $0x38] sm:$0xff]  ;;  %v279_v21 = vpack.c.bf16 %v271_v19, %v263_v18  ;;  %v273_v22 = vld [vmem:[#allocation2 + $0x70] sm:$0xff]  ;;  %v980_v13 = vld [vmem:[%s254_s14] sm:$0x1]  ;;  %p1475_p9 = scmp.ne.s32.totalorder %s1808_s13, %s1474_s9  ;;  %p1482_p5 = scmp.lt.s32.totalorder %s1480_s29, %s1474_s9 }
  0x74   : > { %1211 = vmatpush3.bf16.msra.mxu0 %v1376_v26  ;;  %v274_v15 = vld [vmem:[#allocation2 + $0x78] sm:$0xff]  ;;  %v281_v23 = vpack.c.bf16 %v273_v22, %v265_v20  ;;  %v1193_v18 = vld [vmem:[%s257_s7] ss:$0 sm:$0xff] }
  0x75   : > { %1233 = vmatpush3.bf16.msra.mxu1 %v1377_v27  ;;  %1212 = vmatprep.subr.bf16.mxu0 %v1378_v28  ;;  %v282_v17 = vpack.c.bf16 %v274_v15, %v266_v14  ;;  %p1476_p1 = pnand %p1475_p9, %p1878_p10  ;;  %p1483_p11 = por %p1482_p5, %p1481_p4 }
  0x76   : > { %1234 = vmatprep.subr.bf16.mxu1 %v1379_v29 }
  0x77   : > { %p1477_p3 = pneg %p1476_p1 }
  0x78   : > { %1213 = vmatpush3.bf16.msra.mxu0 %v1380_v30 }
  0x79   : > { %1235 = vmatpush3.bf16.msra.mxu1 %v1381_v31  ;;  %1242 = vmatprep.subr.bf16.mxu0 %v1382_v44  ;;  %p1484_p13 = pnand %p1483_p11, %p1477_p3 }
  0x7a   : > { %1264 = vmatprep.subr.bf16.mxu1 %v1383_v45 }
  0x7b   : > { %828 = vmatmul.mubr.bf16.vlgmr.msra.gmra.mrb[0].mxu0 %v275_v40 }
  0x7c   : > { %869 = vmatmul.mubr.bf16.vlgmr.msra.gmra.mrb[0].mxu1 %v277_v43  ;;  %1243 = vmatpush3.bf16.msra.mxu0 %v1384_v46 }
  0x7d   : > { %1265 = vmatpush3.bf16.msra.mxu1 %v1385_v47  ;;  %1244 = vmatprep.subr.bf16.mxu0 %v1386_v48 }
  0x7e   : > { %1266 = vmatprep.subr.bf16.mxu1 %v1387_v49  ;;  %909 = vmatprep.mubr.bf16.mxu0 %v280_v16 }
  0x7f   : > { %950 = vmatprep.mubr.bf16.mxu1 %v282_v17 }
  0x80   : > { %1245 = vmatpush3.bf16.msra.mxu0 %v1388_v50 }
  0x81   : > { %1267 = vmatpush3.bf16.msra.mxu1 %v1389_v51  ;;  %1246 = vmatprep.subr.bf16.mxu0 %v1390_v52 }
  0x82   : > { %1268 = vmatprep.subr.bf16.mxu1 %v1391_v53 }
  0x84   : > { %1247 = vmatpush3.bf16.msra.mxu0 %v1392_v54 }
  0x85   : > { %1269 = vmatpush3.bf16.msra.mxu1 %v1393_v55  ;;  %1248 = vmatprep.subr.bf16.mxu0 %v1394_v56 }
  0x86   : > { %1270 = vmatprep.subr.bf16.mxu1 %v1395_v57 }
  0x88   : > { %1249 = vmatpush3.bf16.msra.mxu0 %v1396_v58 }
  0x89   : > { %1271 = vmatpush3.bf16.msra.mxu1 %v1397_v59  ;;  %1250 = vmatprep.subr.bf16.mxu0 %v1398_v60 }
  0x8a   : > { %1272 = vmatprep.subr.bf16.mxu1 %v1399_v61 }
  0x8c   : > { %1251 = vmatpush3.bf16.msra.mxu0 %v1400_v62 }
  0x8d   : > { %1273 = vmatpush3.bf16.msra.mxu1 %v1401_v63  ;;  %1252 = vmatprep.subr.bf16.mxu0 %v1402_v0 }
  0x8e   : > { %1274 = vmatprep.subr.bf16.mxu1 %v1403_v1 }
  0x90   : > { %1253 = vmatpush3.bf16.msra.mxu0 %v1404_v2 }
  0x91   : > { %1275 = vmatpush3.bf16.msra.mxu1 %v1405_v3  ;;  %1254 = vmatprep.subr.bf16.mxu0 %v1406_v4 }
  0x92   : > { %1276 = vmatprep.subr.bf16.mxu1 %v1407_v5 }
  0x94   : > { %1255 = vmatpush3.bf16.msra.mxu0 %v1408_v6 }
  0x95   : > { %1277 = vmatpush3.bf16.msra.mxu1 %v1409_v7  ;;  %1256 = vmatprep.subr.bf16.mxu0 %v1410_v8 }
  0x96   : > { %1278 = vmatprep.subr.bf16.mxu1 %v1411_v9 }
  0x98   : > { %1257 = vmatpush3.bf16.msra.mxu0 %v1412_v10 }
  0x99   : > { %1279 = vmatpush3.bf16.msra.mxu1 %v1413_v11  ;;  %v985_v11 = vlaneseq }
  0x9b   : > { %910 = vmatmul.mubr.bf16.vlgmr.msra.gmra.mrb[4].mxu0 %v279_v21  ;;  %v986_v12 = vshrl.u32 %v985_v11, 7 }
  0x9c   : > { %951 = vmatmul.mubr.bf16.vlgmr.msra.gmra.mrb[4].mxu1 %v281_v23 }
  0x9d   : > { %v987_v14 = vsub.s32 0, %v986_v12 }
 0x14e   : > { %v1214_v24 = vpop.f32.mrb[0].mxu0 }
 0x14f   : > { %v1236_v25 = vpop.f32.mrb[0].mxu1  ;;  %v1215_v26 = vpop.f32.mrb[1].mxu0 }
 0x150   : > { %v1216_v27 = vadd.f32 %v1215_v26, %v1214_v24  ;;  %v1237_v28 = vpop.f32.mrb[1].mxu1  ;;  %v1217_v29 = vpop.f32.mrb[2].mxu0 }
 0x151   : > { %v1238_v30 = vadd.f32 %v1237_v28, %v1236_v25  ;;  %v1239_v31 = vpop.f32.mrb[2].mxu1  ;;  %v1218_v32 = vpop.f32.mrb[3].mxu0 }
 0x152   : > { %v1219_v33 = vadd.f32 %v1218_v32, %v1217_v29  ;;  %v1240_v34 = vpop.f32.mrb[3].mxu1 }
 0x153   : > { %v871_v35 = vadd.f32 %v1238_v30, %v1216_v27  ;;  %v1241_v36 = vadd.f32 %v1240_v34, %v1239_v31 }
 0x155   : > { %v874_v37 = vadd.f32 %v1241_v36, %v1219_v33 }
 0x16e   : > { %v1258_v38 = vpop.f32.mrb[4].mxu0 }
 0x16f   : > { %v1280_v39 = vpop.f32.mrb[4].mxu1  ;;  %v1259_v40 = vpop.f32.mrb[5].mxu0 }
 0x170   : > { %v1260_v41 = vadd.f32 %v1259_v40, %v1258_v38  ;;  %v1281_v42 = vpop.f32.mrb[5].mxu1  ;;  %v1261_v43 = vpop.f32.mrb[6].mxu0 }
 0x171   : > { %v1282_v44 = vadd.f32 %v1281_v42, %v1280_v39  ;;  %v1283_v45 = vpop.f32.mrb[6].mxu1  ;;  %v1262_v46 = vpop.f32.mrb[7].mxu0 }
 0x172   : > { %v912_v47 = vadd.f32 %v1260_v41, %v871_v35  ;;  %v1263_v48 = vadd.f32 %v1262_v46, %v1261_v43  ;;  %v1284_v49 = vpop.f32.mrb[7].mxu1 }
 0x173   : > { %v1285_v50 = vadd.f32 %v1284_v49, %v1283_v45 }
 0x174   : > { %v953_v51 = vadd.f32 %v1282_v44, %v912_v47  ;;  %v915_v52 = vadd.f32 %v1263_v48, %v874_v37 }
 0x176   : > { %v956_v53 = vadd.f32 %v1285_v50, %v915_v52 }
 0x178   : > { %v959_v54 = vadd.f32 %v956_v53, %v953_v51 }
 0x17a   : > { %v960_v55 = vrot.slane %v959_v54, 4 }
 0x17c   : > { %v961_v56 = vadd.f32 %v960_v55, %v959_v54 }
 0x17e   : > { %v962_v57 = vrot.slane %v961_v56, 2 }
 0x180   : > { %v963_v58 = vadd.f32 %v962_v57, %v961_v56 }
 0x182   : > { %v964_v59 = vrot.slane %v963_v58, 1 }
 0x184   : > { %v965_v60 = vadd.f32 %v964_v59, %v963_v58 }
 0x186   : > { %v967_v61 = vmul.f32 0.0625, %v965_v60 }
 0x188   : > { %v968_v62 = vsub.f32 %v953_v51, %v967_v61  ;;  %v969_v63 = vsub.f32 %v956_v53, %v967_v61 }
 0x18a   : > { %v970_v0 = vmul.f32 %v968_v62, %v968_v62  ;;  %v971_v1 = vmul.f32 %v969_v63, %v969_v63 }
 0x18c   : > { %v972_v2 = vadd.f32 %v971_v1, %v970_v0 }
 0x18e   : > { %v973_v3 = vrot.slane %v972_v2, 4 }
 0x190   : > { %v974_v4 = vadd.f32 %v973_v3, %v972_v2 }
 0x192   : > { %v975_v5 = vrot.slane %v974_v4, 2 }
 0x194   : > { %v976_v6 = vadd.f32 %v975_v5, %v974_v4 }
 0x196   : > { %v977_v7 = vrot.slane %v976_v6, 1 }
 0x198   : > { %v978_v8 = vadd.f32 %v977_v7, %v976_v6 }
 0x19a   : > { %v979_v9 = vmul.f32 0.0625, %v978_v8 }
 0x19c   : > { %v981_v10 = vadd.f32 1e-05, %v979_v9 }
 0x19e   : > { %1414 = vrsqrt.f32 %v981_v10 }
 0x1a8   : > { %v1415_v15 = vpop.eup %1414 }
 0x1a9   : > { %v983_v16 = vmul.f32 %v1415_v15, %v980_v13 }
 0x1ab   : > { %v988_v17 = vrot.slane %v983_v16, %v987_v14 }
 0x1ad   : > { %v990_v19 = vmul.f32 %v988_v17, %v968_v62  ;;  %v991_v20 = vmul.f32 %v988_v17, %v969_v63 }
 0x1af   : > { %v999_v21 = vadd.f32 %v1193_v18, %v990_v19  ;;  %v1000_v22 = vadd.f32 %v1193_v18, %v991_v20 }
 0x1b1   : > { %1001 = vst [vmem:[%s251_s10] sm:$0xff] %v999_v21  ;;  %1002 = vst [vmem:[%s251_s10 + $0x8] sm:$0xff] %v1000_v22 }
 0x1b2   : > { %1487 = shalt.err (!%p1484_p13)
}
 0x1b3   : > { %s1488_s23 = scalar_lea.hbm %s1813_s8, 256  ;;  %s1492_s6 = scalar_lea.hbm %s1860_s4, 768 }
 0x1b4   : > { %p1489_p2 = scmp.ne.s32.totalorder %s1813_s8, %s1488_s23  ;;  %p1493_p7 = scmp.lt.u32.totalorder %s1813_s8, %s1860_s4 }
 0x1b5   : > { %p1494_p0 = scmp.lt.u32.totalorder %s1492_s6, %s1488_s23  ;;  %p1496_p9 = scmp.lt.u32.totalorder %s1488_s23, %s1813_s8 }
 0x1b6   : > { %p1490_p6 = pnand %p1489_p2, %p1878_p10 }
 0x1b7   : > { %p1495_p8 = por %p1494_p0, %p1493_p7 }
 0x1b8   : > { %p1491_p12 = pneg %p1490_p6 }
 0x1b9   : > { %p1497_p1 = por %p1496_p9, %p1495_p8 }
 0x1bb   : > { %p1498_p3 = pnand %p1497_p1, %p1491_p12 }
 0x1bd   : > { %1501 = shalt.err (!%p1498_p3)
}
 0x1be   : > { %s1553_s10 = smov 128   ;;  %s1554_s5 = smov 384  }
 0x1bf   : > { %s1555_s20 = smov 8  }
 0x1c0   : > { %1292 = dma.vmem_to_hbm [thread:$0]  (%p1878_p10), %s1808_s13, 256, %s1813_s8, %s1004_s11, %s1553_s10, %s1554_s5, %s1555_s20  }
 0x1c1 PF: > { %p1309_p4 = scmp.ge.s32.totalorder %s1544_s18, 2  ;;  %s1031_s22 = sand.u32 1, %s1532_s15  }
 0x1c2   : > { %p1879_p5 = scmp.ne.s32.totalorder %s1868_s28, 0  ;;  %s1032_s9 = scalar_lea.sflag [#allocation4], %s1031_s22 }
 0x1c4   : > { %p1303_p11 = pnand %p1309_p4, %p1879_p5 }
 0x1c6   : > { %1527 = dma.done.wait (!%p1303_p11), %s1032_s9, 256  }
 0x1c7   : > { %1529 = vsyncadd (!%p1303_p11), %s1032_s9, 4294967040  ;;  %p18_p13 = scmp.ge.s32.totalorder %s1606_s21, 5   ;;  %s1880_s15 = smov %s1536_s16 }
 0x1c8   : > { %s1881_s16 = smov %s1540_s17  ;;  %s1882_s17 = smov %s1618_s24 }
 0x1c9   : > { %s1883_s18 = smov %s1606_s21  ;;  %20 = sbr.rel (!%p18_p13) target bundleno = 6 (0x6), region = 92 }
 0x1d0   :  { %1037 = vsyncpa [#allocation3], 1 }
 0x1d1   :  { %1039 = vsyncpa [#allocation3 + $0x1], 1 }
 0x1d2   :  { %1040 = vsyncpa [#allocation6], 1 }
 0x1d3   :  { %1042 = vsyncpa [#allocation6 + $0x1], 1 }
 0x1d4   :  { %1043 = vsyncpa [#allocation4], 1 }
 0x1d5   :  { %1045 = vsyncpa [#allocation4 + $0x1], 1 }

</bundles_post_ra>
